<compile_context>
chip_gen: v7x
topology: tpu7x:2x2x1
jax: 0.10.0
libtpu: 0.0.40
codegen_flags: <defaults>
</compile_context>

<pallas_src>
import functools

import jax
import jax.numpy as jnp
from jax.experimental import pallas as pl
from jax.experimental.pallas import tpu as pltpu


_LANE = 128
_SUBLANE = 8
# Combined (input + output) VMEM bytes targeted per grid-step block.  Double
# buffering roughly doubles the live footprint; 4 MiB keeps us comfortably under
# the scoped-VMEM limits on v5e/v6e/v7x together with the 32 MiB limit below.
_TARGET_BLOCK_BYTES = 4 << 20
_VMEM_LIMIT_BYTES = 32 * 1024 * 1024


# ----------------------------- tiling plan ---------------------------------- #

def _round_up(v, m):
    return ((v + m - 1) // m) * m


def _plan_row_tile(n_rows, per_row_bytes):
    """Pick (row_tile, grid) for a 1-D row grid.

    * Tile sized purely by bytes (no artificial row cap).
    * `per_row_bytes` must already include the lane-padded footprint of every
      per-row input block (e.g. the (tile, 1) x column pads to 128 lanes).
    * Work is balanced across grid steps; >= 2 steps are forced when there is
      enough work (engages both v7x TensorCores, restores DMA/compute overlap).
    * When one block suffices, row_tile == n_rows exactly (block_shape == full
      array dims), so no padding and no wrapper-side output slice are needed.
    """
    n_rows = max(int(n_rows), 1)
    per_row_bytes = max(int(per_row_bytes), 1)
    cap = max(_SUBLANE,
              (_TARGET_BLOCK_BYTES // per_row_bytes) // _SUBLANE * _SUBLANE)
    if n_rows <= cap:
        if n_rows >= 2 * _SUBLANE and n_rows * per_row_bytes >= (1 << 20):
            row_tile = _round_up(pl.cdiv(n_rows, 2), _SUBLANE)   # 2 balanced tiles
        else:
            return n_rows, 1                                     # one exact block
    else:
        grid0 = pl.cdiv(n_rows, cap)
        row_tile = _round_up(pl.cdiv(n_rows, grid0), _SUBLANE)   # balanced tiles
    return row_tile, pl.cdiv(n_rows, row_tile)


# ----------------------------- kernels -------------------------------------- #

def _sinusoidal_kernel(x_ref, fp_ref, o_ref):
    # x_ref: (tile, 1) f32 ; fp_ref: (2, width) f32 (row0 = scale*[f, f],
    # row1 = [0..0, pi/2..pi/2]) ; o_ref: (tile, width).
    # Single full-width lane-dense store: cos(t) == sin(t + pi/2).
    o_ref[...] = jnp.sin(x_ref[...] * fp_ref[0:1, :] + fp_ref[1:2, :]).astype(o_ref.dtype)


def _affine_row_kernel(x_ref, wb_ref, o_ref):
    # x_ref: (tile, 1) f32 ; wb_ref: (2, size) f32 (row0 = W/size, row1 = bias).
    # nn.Linear(1, size)(x/size) == outer product on the VPU (MXU would be <1% util).
    o_ref[...] = (x_ref[...] * wb_ref[0:1, :] + wb_ref[1:2, :]).astype(o_ref.dtype)


def _scale_kernel(x_ref, o_ref, *, inv):
    # Lane-dense (tile, 128) elementwise scale; inv = scale / size pre-folded.
    o_ref[...] = (x_ref[...] * inv).astype(o_ref.dtype)


# ----------------------------- wrappers ------------------------------------- #

def _row_affine_call(kernel, x, table, width, out_dtype):
    """Shared row-grid launcher: x -> (n, 1), table (2, width) VMEM-resident."""
    n = x.shape[0]
    per_row = width * jnp.dtype(out_dtype).itemsize + _LANE * 4   # out row + lane-padded x row
    tile, grid = _plan_row_tile(n, per_row)
    x2 = x.astype(jnp.float32).reshape(n, 1)
    return pl.pallas_call(
        kernel,
        out_shape=jax.ShapeDtypeStruct((n, width), out_dtype),
        grid=(grid,),
        in_specs=[pl.BlockSpec((tile, 1), lambda i: (i, 0)),
                  pl.BlockSpec((2, width), lambda i: (0, 0))],    # VMEM-resident rows
        out_specs=pl.BlockSpec((tile, width), lambda i: (i, 0)),
        compiler_params=pltpu.CompilerParams(
            dimension_semantics=("parallel",),
            vmem_limit_bytes=_VMEM_LIMIT_BYTES),
    )(x2, table)


def sinusoidal_embedding(x, size, scale=1.0, out_dtype=jnp.float32):
    half = size // 2
    if half < 2:
        # half == 1 would divide by zero below (nan freqs in the torch module too).
        raise ValueError("sinusoidal embedding requires size >= 4")
    width = 2 * half   # NOTE: odd `size` -> width 2*(size//2), exactly like PyTorch.
    f = jnp.exp(-(jnp.log(10000.0) / (half - 1)) * jnp.arange(half, dtype=jnp.float32))
    freqs_full = jnp.concatenate([f, f]) * jnp.float32(scale)      # scale folded in
    phase = jnp.concatenate([jnp.zeros((half,), jnp.float32),
                             jnp.full((half,), jnp.pi / 2, jnp.float32)])
    table = jnp.stack([freqs_full, phase])                         # (2, width)
    return _row_affine_call(_sinusoidal_kernel, x, table, width, out_dtype)


def learnable_embedding(x, size, weight, bias, out_dtype=jnp.float32):
    # weight: (size, 1) (same layout as nn.Linear(1, size).weight), bias: (size,)
    # Fold the /size pre-division of the input into the resident weight row.
    w = weight.astype(jnp.float32).reshape(1, size) / jnp.float32(size)
    b = bias.astype(jnp.float32).reshape(1, size)
    table = jnp.concatenate([w, b], axis=0)                        # (2, size)
    return _row_affine_call(_affine_row_kernel, x, table, size, out_dtype)


def linear_embedding(x, size, scale=1.0, out_dtype=jnp.float32):
    # x * (scale/size) -> (n, 1).  Presented to the kernel as a lane-dense
    # (rows, 128) slab (a (n, 1) output column would be all masked 1-lane stores).
    # For production this trivial op could be left to plain XLA.
    n = x.shape[0]
    inv = float(scale) / float(size)
    rows = pl.cdiv(n, _LANE)
    n_pad = rows * _LANE
    per_row = _LANE * (4 + jnp.dtype(out_dtype).itemsize)
    tile, grid = _plan_row_tile(rows, per_row)

    xp = x.astype(jnp.float32)
    if n_pad != n:
        xp = jnp.pad(xp, (0, n_pad - n))
    xp = xp.reshape(rows, _LANE)

    out = pl.pallas_call(
        functools.partial(_scale_kernel, inv=inv),
        out_shape=jax.ShapeDtypeStruct((rows, _LANE), out_dtype),
        grid=(grid,),
        in_specs=[pl.BlockSpec((tile, _LANE), lambda i: (i, 0))],
        out_specs=pl.BlockSpec((tile, _LANE), lambda i: (i, 0)),
        compiler_params=pltpu.CompilerParams(
            dimension_semantics=("parallel",),
            vmem_limit_bytes=_VMEM_LIMIT_BYTES),
    )(xp)
    out = out.reshape(-1)
    if n_pad != n:
        out = out[:n]
    return out.reshape(n, 1)                                       # matches x.unsqueeze(-1)


class PositionalEmbedding:
    """JAX/Pallas port of the PyTorch PositionalEmbedding module."""

    def __init__(self, size, emb_type, scale=1.0, key=None, out_dtype=jnp.float32):
        self.size = size
        self.emb_type = emb_type
        self.scale = scale
        self.out_dtype = out_dtype
        if emb_type == "learnable":
            # Mirrors nn.Linear(1, size) init: U(-1, 1) since fan_in == 1.
            key = jax.random.PRNGKey(42) if key is None else key
            kw, kb = jax.random.split(key)
            self.weight = jax.random.uniform(kw, (size, 1), jnp.float32, -1.0, 1.0)
            self.bias = jax.random.uniform(kb, (size,), jnp.float32, -1.0, 1.0)
        elif emb_type not in ("sinusoidal", "linear"):
            raise ValueError(f"Unknown positional embedding type: {emb_type}")

    def __call__(self, x):
        if self.emb_type == "sinusoidal":
            return sinusoidal_embedding(x, self.size, self.scale, self.out_dtype)
        elif self.emb_type == "linear":
            return linear_embedding(x, self.size, self.scale, self.out_dtype)
        else:  # learnable
            return learnable_embedding(x, self.size, self.weight, self.bias,
                                       self.out_dtype)


# ----------------------------- references ----------------------------------- #

def _ref_sinusoidal(x, size, scale):
    half = size // 2
    xs = x.astype(jnp.float32) * scale
    f = jnp.exp(-(jnp.log(10000.0) / (half - 1)) * jnp.arange(half, dtype=jnp.float32))
    emb = xs[:, None] * f[None, :]
    return jnp.concatenate([jnp.sin(emb), jnp.cos(emb)], axis=-1)


def _ref_linear(x, size, scale):
    return (x.astype(jnp.float32) / size * scale)[:, None]


def _ref_learnable(x, size, weight, bias):
    return (x.astype(jnp.float32)[:, None] / size) @ weight.T + bias[None, :]


# ------------------------------- main ---------------------------------------- #

if __name__ == "__main__":
    key = jax.random.PRNGKey(0)
    N, SIZE = 8, 32
    x = jax.random.uniform(key, (N,), jnp.float32, 0.0, 100.0)   # timesteps

    # sinusoidal (atol 1e-4: cos(t) is computed as sin(t + pi/2) in-kernel)
    pe_sin = PositionalEmbedding(SIZE, "sinusoidal", scale=1.0)
    out_sin = jax.block_until_ready(pe_sin(x))
    assert out_sin.shape == (N, SIZE)
    assert jnp.allclose(out_sin, _ref_sinusoidal(x, SIZE, 1.0), atol=1e-4)

    # linear
    pe_lin = PositionalEmbedding(SIZE, "linear", scale=2.0)
    out_lin = jax.block_until_ready(pe_lin(x))
    assert out_lin.shape == (N, 1)
    assert jnp.allclose(out_lin, _ref_linear(x, SIZE, 2.0), atol=1e-6)

    # learnable
    pe_learn = PositionalEmbedding(SIZE, "learnable")
    out_learn = jax.block_until_ready(pe_learn(x))
    assert out_learn.shape == (N, SIZE)
    assert jnp.allclose(out_learn,
                        _ref_learnable(x, SIZE, pe_learn.weight, pe_learn.bias),
                        atol=1e-5)

    # Multi-step parallel grid (2 balanced tiles, lane-aligned width).
    x_big = jax.random.uniform(jax.random.PRNGKey(1), (2048,), jnp.float32, 0.0, 100.0)
    pe_big = PositionalEmbedding(128, "sinusoidal", scale=1.0)
    out_big = jax.block_until_ready(pe_big(x_big))
    assert out_big.shape == (2048, 128)
    assert jnp.allclose(out_big, _ref_sinusoidal(x_big, 128, 1.0), atol=1e-4)

    # Non-multiple-of-8 n: single block == full array dims, no pad / no slice.
    x_odd = jax.random.uniform(jax.random.PRNGKey(2), (1000,), jnp.float32, 0.0, 100.0)
    out_odd = jax.block_until_ready(sinusoidal_embedding(x_odd, SIZE))
    assert out_odd.shape == (1000, SIZE)
    assert jnp.allclose(out_odd, _ref_sinusoidal(x_odd, SIZE, 1.0), atol=1e-4)

    print("KERNEL_OK")
</pallas_src>

<mosaic_0001>
module attributes {stable_mosaic.version = 11 : i64} {
  func.func @_sinusoidal_kernel(%arg0: i32, %arg1: memref<8x1xf32, #tpu.memory_space<vmem>>, %arg2: memref<2x32xf32, #tpu.memory_space<vmem>>, %arg3: memref<8x32xf32, #tpu.memory_space<vmem>>) attributes {dimension_semantics = [#tpu.dimension_semantics<parallel>], iteration_bounds = array<i64: 1>, scalar_prefetch = 0 : i64, scratch_operands = 0 : i64, tpu.core_type = #tpu.core_type<tc>, window_params = [{transform_indices = @transform_0, window_bounds = array<i64: 8, 1>}, {pipeline_mode = #tpu.pipeline_mode<synchronous>, transform_indices = @transform_1, window_bounds = array<i64: 2, 32>}, {transform_indices = @transform_2, window_bounds = array<i64: 8, 32>}]} {
    %c0 = arith.constant 0 : index
    %c0_0 = arith.constant 0 : index
    %0 = vector.load %arg1[%c0, %c0_0] : memref<8x1xf32, #tpu.memory_space<vmem>>, vector<8x1xf32>
    %c0_1 = arith.constant 0 : index
    %c0_2 = arith.constant 0 : index
    %1 = vector.load %arg2[%c0_1, %c0_2] : memref<2x32xf32, #tpu.memory_space<vmem>>, vector<1x32xf32>
    %2 = vector.broadcast %0 : vector<8x1xf32> to vector<8x32xf32>
    %3 = vector.broadcast %1 : vector<1x32xf32> to vector<8x32xf32>
    %4 = arith.mulf %2, %3 : vector<8x32xf32>
    %c1 = arith.constant 1 : index
    %c0_3 = arith.constant 0 : index
    %5 = vector.load %arg2[%c1, %c0_3] : memref<2x32xf32, #tpu.memory_space<vmem>>, vector<1x32xf32>
    %6 = vector.broadcast %5 : vector<1x32xf32> to vector<8x32xf32>
    %7 = arith.addf %4, %6 : vector<8x32xf32>
    %8 = math.sin %7 : vector<8x32xf32>
    %c0_4 = arith.constant 0 : index
    %c0_5 = arith.constant 0 : index
    %9 = vector.load %arg3[%c0_4, %c0_5] : memref<8x32xf32, #tpu.memory_space<vmem>>, vector<8x32xf32>
    tpu.vector_store %arg3[%c0_4, %c0_5], %8 {strides = array<i32>} : memref<8x32xf32, #tpu.memory_space<vmem>>, vector<8x32xf32>,
    return
  }
  func.func @transform_0(%arg0: i32) -> (i32, i32) {
    %c0_i32 = arith.constant 0 : i32
    %c0_i32_0 = arith.constant 0 : i32
    return %arg0, %c0_i32 : i32, i32
  }
  func.func @transform_1(%arg0: i32) -> (i32, i32) {
    %c0_i32 = arith.constant 0 : i32
    %c0_i32_0 = arith.constant 0 : i32
    %c0_i32_1 = arith.constant 0 : i32
    return %c0_i32, %c0_i32_0 : i32, i32
  }
  func.func @transform_2(%arg0: i32) -> (i32, i32) {
    %c0_i32 = arith.constant 0 : i32
    %c0_i32_0 = arith.constant 0 : i32
    return %arg0, %c0_i32 : i32, i32
  }
}

</mosaic_0001>

<bundles_post_ra>
// kernel: tpu_custom_call.1
= control target key start
LH: loop header
LB: loop body
LE: loop exit
PB: predicated region body
PF: predicated region fallthrough
CT: control target
= control target key end

     0   :  { %v197_v1 = vmov 0   ;;  %s262_s0 = inlined_call_operand.vmem [shape: f32[8,1], index: 0, kind: input, shape index: {}]   ;;  %s263_s1 = inlined_call_operand.vmem [shape: f32[2,32], index: 1, kind: input, shape index: {}]   ;;  %s264_s2 = inlined_call_operand.hbm [shape: f32[8,32], index: 2, kind: output, shape index: {}]  }
   0x1   :  { %v12_v0 = vld [vmem:[%s262_s0] sm:$0xff]  ;;  %168 = vset.pattern.permute.xlu0 %v197_v1 }
   0x2   :  { %16 = vperm.xlu0 %168, %v12_v0  }
   0x3   :  { %7 = vsyncpa [#allocation3], 0  ;;  %v150_v2 = vld [vmem:[%s263_s1] ss:$0 sm:$0xff]  ;;  %v151_v3 = vld [vmem:[%s263_s1 + $0x1] ss:$0 sm:$0xff] }
   0x4   :  { %v198_v18 = vmov 2102212464   ;;  %v199_v20 = vmov 920167782   ;;  %v200_v24 = vmov 1326507024  }
   0x5   :  { %v201_v26 = vmov 683565275   ;;  %v202_v28 = vmov 2475754826   ;;  %v203_v31 = vmov 2131351028  }
   0x6   :  { %s204_s0 = smov [#allocation2]   ;;  %vm134_vm12 = vcmask 261120  }
   0x7   :  { %s142_s1 = sshll.u32 %s204_s0, 4  ;;  %s143_s1 = int_to_ptr.vmem [resolvable:$true] %s142_s1 }
   0x8   :  { %s173_s15 = scalar_lea.vmem %s143_s1, 128  ;;  %p178_p1 = scmp.lt.s32.totalorder %s143_s1, %s143_s1 }
   0x9   :  { %p174_p0 = scmp.ne.s32.totalorder %s143_s1, %s173_s15  ;;  %p179_p2 = scmp.lt.s32.totalorder %s173_s15, %s173_s15 }
   0xb   :  { %p180_p3 = por %p179_p2, %p178_p1 }
   0xd   :  { %p181_p4 = pnand %p180_p3, %p174_p0 }
  0x81   :  { %v17_v4 = vpop.permute.xlu0 %16 }
  0x82   :  { %v23_v5 = vmul.f32 %v150_v2, %v17_v4 }
  0x84   :  { %v229_v6 = vadd.f32 %v151_v3, %v23_v5 }
  0x86   :  { %v33_v7 = vand.u32 2139095040, %v229_v6  ;;  %v30_v8 = vand.u32 2147483647, %v229_v6  ;;  %vm32_vm7 = vcmp.lt.s32.totalorder %v229_v6, 0  ;;  %vm122_vm13 = vweird.f32 %v229_v6 }
  0x88   :  { %v34_v9 = vshrl.u32 %v33_v7, 23  ;;  %v37_v11 = vand.u32 8388607, %v30_v8  ;;  %vm31_vm8 = vcmp.le.f32.partialorder %v30_v8, 0.7853982 }
  0x8a   :  { %v152_v10 = vadd.s32 4294967169, %v34_v9  ;;  %v38_v14 = vor.u32 8388608, %v37_v11 }
  0x8c   :  { %v40_v12 = vadd.s32 1, %v152_v10  ;;  %v78_v22 = vshll.u32 %v38_v14, 8 }
  0x8e   :  { %vm41_vm0 = vcmp.gt.s32.totalorder %v40_v12, 0 }
  0x8f   :  { %v42_v13 = vsel %vm41_vm0, %v40_v12, 0 }
  0x90   :  { %v44_v15 = vand.u32 31, %v42_v13  ;;  %v43_v16 = vshrl.u32 %v42_v13, 5 }
  0x92   :  { %v45_v17 = vsub.s32 32, %v44_v15  ;;  %v56_v19 = vshll.u32 %v198_v18, %v44_v15  ;;  %v59_v21 = vshll.u32 %v199_v20, %v44_v15  ;;  %v47_v27 = vshll.u32 %v201_v26, %v44_v15 }
  0x93   :  { %v50_v30 = vshll.u32 %v202_v28, %v44_v15  ;;  %v53_v33 = vshll.u32 %v203_v31, %v44_v15  ;;  %vm65_vm1 = vcmp.lt.s32.totalorder %v43_v16, 4  ;;  %vm62_vm2 = vcmp.lt.s32.totalorder %v43_v16, 1 }
  0x94   :  { %v57_v23 = vshrl.u32 %v199_v20, %v45_v17  ;;  %v60_v25 = vshrl.u32 %v200_v24, %v45_v17  ;;  %v48_v29 = vshrl.u32 %v202_v28, %v45_v17  ;;  %v51_v32 = vshrl.u32 %v203_v31, %v45_v17 }
  0x95   :  { %v54_v34 = vshrl.u32 %v198_v18, %v45_v17  ;;  %v46_v38 = vshrl.u32 %v201_v26, %v45_v17  ;;  %vm63_vm3 = vcmp.lt.s32.totalorder %v43_v16, 2  ;;  %vm64_vm4 = vcmp.lt.s32.totalorder %v43_v16, 3 }
  0x96   :  { %v58_v35 = vor.u32 %v57_v23, %v56_v19  ;;  %v61_v36 = vor.u32 %v60_v25, %v59_v21  ;;  %v49_v37 = vor.u32 %v48_v29, %v47_v27  ;;  %v52_v39 = vor.u32 %v51_v32, %v50_v30 }
  0x97   :  { %v55_v40 = vor.u32 %v54_v34, %v53_v33 }
  0x98   :  { %v71_v41 = vsel %vm65_vm1, %v58_v35, 920167782  ;;  %v75_v42 = vsel %vm65_vm1, %v61_v36, 1326507024  ;;  %v70_v44 = vsel %vm62_vm2, %v49_v37, %v52_v39  ;;  %v66_v47 = vsel %vm62_vm2, %v46_v38, %v49_v37 }
  0x99   :  { %v67_v43 = vsel %vm65_vm1, %v55_v40, 2102212464  ;;  %v72_v45 = vsel %vm64_vm4, %v55_v40, %v71_v41  ;;  %v74_v46 = vsel %vm62_vm2, %v52_v39, %v55_v40  ;;  %v76_v50 = vsel %vm64_vm4, %v58_v35, %v75_v42 }
  0x9a   :  { %v68_v48 = vsel %vm64_vm4, %v52_v39, %v67_v43  ;;  %v73_v49 = vsel %vm63_vm3, %v70_v44, %v72_v45  ;;  %v77_v51 = vsel %vm63_vm3, %v74_v46, %v76_v50 }
  0x9b   :  { %v235_v52 = vmul.u32.u64.low %v78_v22, %v73_v49  ;;  %v236_v53 = vmul.u32.u64.high %v78_v22, %v73_v49, %v235_v52  ;;  %v238_v54 = vmul.u32.u64.low %v78_v22, %v77_v51  ;;  %v239_v55 = vmul.u32.u64.high %v78_v22, %v77_v51, %v238_v54 }
  0x9c   :  { %v69_v56 = vsel %vm63_vm3, %v66_v47, %v68_v48 }
  0x9d   :  { %v88_v57 = vadd.s32 1, %v236_v53  ;;  %v85_v58 = vmul.u32 %v78_v22, %v69_v56  ;;  %vm87_vm5 = vc.u32 %v239_v55, %v235_v52  ;;  %v86_v7 = vadd.s32 %v235_v52, %v239_v55 }
  0x9f   :  { %v89_v59 = vsel %vm87_vm5, %v88_v57, %v236_v53 }
  0xa0   :  { %v90_v60 = vadd.s32 %v89_v59, %v85_v58 }
  0xa2   :  { %v91_v61 = vadd.s32 536870912, %v90_v60 }
  0xa4   :  { %v92_v62 = vshrl.u32 %v91_v61, 30 }
  0xa6   :  { %v93_v63 = vshll.u32 %v92_v62, 30  ;;  %v116_v20 = vsub.s32 4, %v92_v62 }
  0xa8   :  { %v94_v0 = vsub.s32 %v90_v60, %v93_v63  ;;  %v117_v23 = vsel %vm32_vm7, %v116_v20, %v92_v62 }
  0xa9   :  { %v119_v25 = vsel %vm31_vm8, 0, %v117_v23 }
  0xaa   :  { %v96_v1 = vsub.s32 0, %v94_v0  ;;  %v123_v26 = vadd.s32 3, %v119_v25 }
  0xac   :  { %v153_v2 = vmin.u32 %v96_v1, %v94_v0  ;;  %v124_v27 = vand.u32 3, %v123_v26 }
  0xae   :  { %v98_v3 = vclz %v153_v2  ;;  %vm129_vm9 = vcmp.eq.s32.totalorder %v124_v27, 2  ;;  %vm126_vm10 = vcmp.eq.s32.totalorder %v124_v27, 0  ;;  %vm125_vm11 = vcmp.lt.s32.totalorder %v124_v27, 2 }
  0xb0   :  { %v154_v4 = vadd.s32 4294967294, %v98_v3 }
  0xb2   :  { %vm155_vm6 = vcmp.lt.s32.totalorder %v154_v4, 0 }
  0xb3   :  { %v101_v5 = vsel %vm155_vm6, 0, %v154_v4 }
  0xb4   :  { %v102_v9 = vsub.s32 32, %v101_v5  ;;  %v106_v10 = vsub.s32 4294967266, %v101_v5  ;;  %v103_v11 = vshll.u32 %v94_v0, %v101_v5 }
  0xb6   :  { %v104_v12 = vshrl.u32 %v86_v7, %v102_v9  ;;  %v107_v13 = vadd.s32 127, %v106_v10 }
  0xb8   :  { %v105_v14 = vor.u32 %v104_v12, %v103_v11  ;;  %v108_v15 = vshll.u32 %v107_v13, 23 }
  0xba   :  { %v109_v16 = vor.u32 4788187, %v108_v15  ;;  %v112_v18 = vcvt.s32.f32 %v105_v14 }
  0xbc   :  { %v110_v17 = vand.u32 2147483647, %v109_v16 }
  0xbe   :  { %v113_v19 = vmul.f32 %v112_v18, %v110_v17 }
  0xc0   :  { %v114_v21 = vxor.u32 2147483648, %v113_v19 }
  0xc2   :  { %v115_v22 = vsel %vm32_vm7, %v114_v21, %v113_v19 }
  0xc3   :  { %v118_v24 = vsel %vm31_vm8, %v229_v6, %v115_v22 }
  0xc4   :  { %169 = vcosq.f32 %v118_v24 }
  0xc5   :  { %171 = vsinq.f32 %v118_v24 }
  0xce   :  { %v170_v28 = vpop.eup %169 }
  0xcf   :  { %v172_v29 = vpop.eup %171  ;;  %v130_v30 = vxor.u32 2147483648, %v170_v28 }
  0xd0   :  { %v127_v31 = vxor.u32 2147483648, %v172_v29 }
  0xd1   :  { %v131_v32 = vsel %vm129_vm9, %v130_v30, %v172_v29 }
  0xd2   :  { %v128_v8 = vsel %vm126_vm10, %v170_v28, %v127_v31 }
  0xd3   :  { %v132_v33 = vsel %vm125_vm11, %v128_v8, %v131_v32 }
  0xd4   :  { %v133_v34 = vsel %vm122_vm13, nan, %v132_v33 }
  0xd5   :  { %135 = vst.msk [vmem:[#allocation2] sm:$0xff] %vm134_vm12, %v133_v34 }
  0xd6   :  { %184 = shalt.err (!%p181_p4)
}
  0xd7   :  { %s185_s18 = scalar_lea.hbm %s264_s2, 128 }
  0xd8   :  { %p186_p5 = scmp.ne.s32.totalorder %s264_s2, %s185_s18  ;;  %p189_p6 = scmp.lt.u32.totalorder %s185_s18, %s264_s2 }
  0xda   :  { %p191_p7 = pnand %p189_p6, %p186_p5 }
  0xdc   :  { %194 = shalt.err (!%p191_p7)
}
  0xdd   :  { %145 = dma.vmem_to_hbm [thread:$0]  %s143_s1, 128, %s264_s2, [#allocation3]  }
  0xde   :  { %195 = dma.done.wait [#allocation3], 128  }
  0xdf   :  { %196 = vsyncadd [#allocation3], 4294967168 }
  0xe0   :  { %149 = vsyncpa [#allocation3], 1 }

</bundles_post_ra>
